<compile_context>
chip_gen: v5e
topology: v5e:2x2
jax: 0.10.0
libtpu: 0.0.40
codegen_flags: <defaults>
</compile_context>

<pallas_src>
import functools

import jax
import jax.numpy as jnp
from jax.experimental import pallas as pl
from jax.experimental.pallas import tpu as pltpu

SMOOTH = 1.0        # BinaryDiceLoss default smooth=1
P_POW = 2           # BinaryDiceLoss default p=2 (hard-coded as squares below)

_LANES = 128
_MAX_TILE_ROWS = 2048            # 2048 * 128 = 256K spatial elements / channel / tile
_F32_TEMPS_PER_ELEM = 6          # rough in-kernel f32 temporary estimate per element


def _dice_partial_kernel(x_ref, t_ref, pt_ref, sq_ref, *, s_total, tile_rows, mask_last):
    """Accumulate per-(batch, channel) partial Dice sums over spatial tiles.

    Block shapes:
      x_ref, t_ref : (1, C, TR, 128)   input tiles (original HBM dtype)
      pt_ref       : (1, C, AR, 128)   f32 running per-lane sums of p*t
      sq_ref       : (1, C, AR, 128)   f32 running per-lane sums of (p+t)^2
    Grid: (N, num_spatial_tiles); axis 0 "parallel", axis 1 reduction.
    """
    s_idx = pl.program_id(1)
    n_s = pl.num_programs(1)
    c = x_ref.shape[1]

    @pl.when(s_idx == 0)
    def _():
        pt_ref[...] = jnp.zeros_like(pt_ref)
        sq_ref[...] = jnp.zeros_like(sq_ref)

    x = x_ref[...].astype(jnp.float32)
    t = t_ref[...].astype(jnp.float32)

    # Softmax over the channel axis (axis=1).  With channels living in separate
    # (TR, 128) slabs this is pure cross-vreg elementwise work (VPU) plus
    # exp / reciprocal on the EUP -- no cross-lane/sublane XLU traffic.
    m = jnp.max(x, axis=1, keepdims=True)
    e = jnp.exp(x - m)
    p = e * pl.reciprocal(jnp.sum(e, axis=1, keepdims=True), approx=True)

    def _fold_rows(v):
        # Reduce the TR tile rows down to the accumulator rows with vreg adds.
        if tile_rows % 8 == 0:
            return jnp.sum(v.reshape(1, c, tile_rows // 8, 8, _LANES), axis=2)
        return jnp.sum(v, axis=2, keepdims=True)

    def _accumulate(p_v, t_v):
        s_v = p_v + t_v
        pt_ref[...] += _fold_rows(p_v * t_v)
        sq_ref[...] += _fold_rows(s_v * s_v)

    if mask_last:
        # Only the final spatial tile can contain padded / out-of-range columns;
        # full tiles take the unmasked fast path.
        @pl.when(s_idx == n_s - 1)
        def _():
            row = jax.lax.broadcasted_iota(jnp.int32, (1, 1, tile_rows, _LANES), 2)
            lane = jax.lax.broadcasted_iota(jnp.int32, (1, 1, tile_rows, _LANES), 3)
            gidx = s_idx * (tile_rows * _LANES) + row * _LANES + lane
            valid = gidx < s_total
            _accumulate(jnp.where(valid, p, 0.0), jnp.where(valid, t, 0.0))

        @pl.when(s_idx != n_s - 1)
        def _():
            _accumulate(p, t)
    else:
        _accumulate(p, t)


def _hw_vmem_bytes():
    try:
        return int(pltpu.get_tpu_info().vmem_capacity_bytes)
    except Exception:
        return 64 * 1024 * 1024      # conservative fallback (v7x per-TC VMEM)


def _per_row_bytes(c, in_itemsize):
    # One 128-lane row of the tile: 2 inputs x 2 pipeline buffers at HBM dtype
    # plus in-kernel f32 temporaries (upcasts, exp, p, products).
    return c * _LANES * (2 * 2 * in_itemsize + _F32_TEMPS_PER_ELEM * 4)


def _plan_tile_rows(c, r, in_itemsize, vmem_bytes):
    budget = int(vmem_bytes * 0.40)
    cap = (budget // _per_row_bytes(c, in_itemsize)) // 8 * 8
    cap = max(8, min(_MAX_TILE_ROWS, cap))
    return r if r <= cap else cap


def _plan_vmem_limit(c, tile_rows, in_itemsize, vmem_bytes):
    working = tile_rows * _per_row_bytes(c, in_itemsize)
    working += 2 * c * 8 * _LANES * 4 + (1 << 16)      # accumulators + slack
    return int(min(vmem_bytes - 16 * 1024 * 1024,
                   max(32 * 1024 * 1024, working * 3 // 2)))


def dice_loss(inputs, target, *, tile_rows=None):
    """inputs, target: (N, C, H, W) arrays of identical shape. Returns scalar loss.

    Matches the PyTorch DiceLoss defaults (smooth=1, p=2, reduction='mean',
    weight=None, ignore_index=None).
    """
    assert inputs.shape == target.shape, "inputs shape dont match target shape"
    N, C, H, W = inputs.shape
    S = H * W
    R = -(-S // _LANES)              # rows of 128 spatial elements
    S_pad = R * _LANES

    # Keep the HBM dtype (cast to f32 in-kernel).  Lane-dense layout: (N,C,R,128).
    x = inputs.reshape(N, C, S)
    t = target.reshape(N, C, S)
    if S_pad != S:
        # TODO(synk): for S % 128 != 0 we pad once in HBM; a flat-lane fallback
        # kernel would avoid this extra copy.
        x = jnp.pad(x, ((0, 0), (0, 0), (0, S_pad - S)))
        t = jnp.pad(t, ((0, 0), (0, 0), (0, S_pad - S)))
    x = x.reshape(N, C, R, _LANES)
    t = t.reshape(N, C, R, _LANES)

    itemsize = max(jnp.dtype(x.dtype).itemsize, jnp.dtype(t.dtype).itemsize)
    vmem_bytes = _hw_vmem_bytes()
    if tile_rows is None:
        TR = _plan_tile_rows(C, R, itemsize, vmem_bytes)
    else:
        TR = min(int(tile_rows), R)
        assert TR == R or TR % 8 == 0, "tile_rows must be a multiple of 8 or cover R"
    n_s = -(-R // TR)
    AR = 8 if TR % 8 == 0 else 1
    mask_last = (n_s * TR * _LANES) != S
    vmem_limit = _plan_vmem_limit(C, TR, itemsize, vmem_bytes)

    kernel = functools.partial(_dice_partial_kernel, s_total=S, tile_rows=TR,
                               mask_last=mask_last)

    pt_part, sq_part = pl.pallas_call(
        kernel,
        out_shape=(
            jax.ShapeDtypeStruct((N, C, AR, _LANES), jnp.float32),
            jax.ShapeDtypeStruct((N, C, AR, _LANES), jnp.float32),
        ),
        grid_spec=pltpu.PrefetchScalarGridSpec(
            num_scalar_prefetch=0,
            grid=(N, n_s),
            in_specs=[
                pl.BlockSpec((1, C, TR, _LANES), lambda n, s: (n, 0, s, 0)),
                pl.BlockSpec((1, C, TR, _LANES), lambda n, s: (n, 0, s, 0)),
            ],
            out_specs=(
                pl.BlockSpec((1, C, AR, _LANES), lambda n, s: (n, 0, 0, 0)),
                pl.BlockSpec((1, C, AR, _LANES), lambda n, s: (n, 0, 0, 0)),
            ),
        ),
        compiler_params=pltpu.CompilerParams(
            dimension_semantics=("parallel", "arbitrary"),
            vmem_limit_bytes=vmem_limit,
        ),
    )(x, t)

    # O(N*C*1024) finalize in plain JAX.
    pt = jnp.sum(pt_part, axis=(2, 3))                 # sum_s p*t
    sq = jnp.sum(sq_part, axis=(2, 3))                 # sum_s (p+t)^2
    p2t2 = sq - 2.0 * pt                               # sum_s (p^2 + t^2)
    num = 2.0 * pt + SMOOTH
    den = p2t2 + SMOOTH
    loss_nc = 1.0 - num / den
    # TODO(synk): non-default weight / ignore_index would be applied here.
    # TODO(synk): for N == 1 on v7x, split the spatial reduction over a leading
    # "parallel" grid axis so both TensorCores get work.
    return jnp.sum(loss_nc) / jnp.float32(N * C)


def _dice_loss_ref(inputs, target):
    """Pure-JAX reference mirroring the PyTorch code path."""
    N, C, H, W = inputs.shape
    p = jax.nn.softmax(inputs.astype(jnp.float32), axis=1)
    t = target.astype(jnp.float32)
    pf = p.reshape(N, C, -1)
    tf = t.reshape(N, C, -1)
    num = 2.0 * jnp.sum(pf * tf, axis=2) + SMOOTH
    den = jnp.sum(pf ** P_POW + tf ** P_POW, axis=2) + SMOOTH
    loss_nc = 1.0 - num / den                 # (N, C)
    per_channel = jnp.mean(loss_nc, axis=0)   # reduction='mean'
    return jnp.sum(per_channel) / C


if __name__ == "__main__":
    key = jax.random.PRNGKey(0)
    k = jax.random.split(key, 6)

    # Test 1: default tiling, S multiple of 128 -> single tile, no masking.
    N, C, H, W = 2, 4, 16, 16
    x1 = jax.random.normal(k[0], (N, C, H, W), dtype=jnp.float32)
    t1 = jax.random.uniform(k[1], (N, C, H, W), dtype=jnp.float32)
    out1 = jax.block_until_ready(dice_loss(x1, t1))
    ref1 = jax.block_until_ready(_dice_loss_ref(x1, t1))
    assert jnp.allclose(out1, ref1, rtol=1e-3, atol=1e-3), (out1, ref1)

    # Test 2: S = 130 (not a multiple of 128) -> pad path + masked last tile.
    x2 = jax.random.normal(k[2], (2, 4, 10, 13), dtype=jnp.float32)
    t2 = jax.random.uniform(k[3], (2, 4, 10, 13), dtype=jnp.float32)
    out2 = jax.block_until_ready(dice_loss(x2, t2))
    ref2 = jax.block_until_ready(_dice_loss_ref(x2, t2))
    assert jnp.allclose(out2, ref2, rtol=1e-3, atol=1e-3), (out2, ref2)

    # Test 3: bf16 inputs + forced small tile (TR=8) -> multi-tile reduction grid
    # exercising the unmasked fast path plus the masked final partial tile.
    x3 = jax.random.normal(k[4], (2, 4, 48, 48), dtype=jnp.bfloat16)
    t3 = jax.random.uniform(k[5], (2, 4, 48, 48), dtype=jnp.bfloat16)
    out3 = jax.block_until_ready(dice_loss(x3, t3, tile_rows=8))
    ref3 = jax.block_until_ready(_dice_loss_ref(x3, t3))
    assert jnp.allclose(out3, ref3, rtol=2e-3, atol=2e-3), (out3, ref3)

    print("KERNEL_OK")
</pallas_src>

<mosaic_0001>
module attributes {stable_mosaic.version = 11 : i64} {
  func.func @_dice_partial_kernel(%arg0: i32, %arg1: i32, %arg2: memref<1x4x2x128xf32, #tpu.memory_space<vmem>>, %arg3: memref<1x4x2x128xf32, #tpu.memory_space<vmem>>, %arg4: memref<1x4x1x128xf32, #tpu.memory_space<vmem>>, %arg5: memref<1x4x1x128xf32, #tpu.memory_space<vmem>>) attributes {dimension_semantics = [#tpu.dimension_semantics<parallel>, #tpu.dimension_semantics<arbitrary>], iteration_bounds = array<i64: 2, 1>, scalar_prefetch = 0 : i64, scratch_operands = 0 : i64, tpu.core_type = #tpu.core_type<tc>, window_params = [{transform_indices = @transform_0, window_bounds = array<i64: 1, 4, 2, 128>}, {transform_indices = @transform_1, window_bounds = array<i64: 1, 4, 2, 128>}, {transform_indices = @transform_2, window_bounds = array<i64: 1, 4, 1, 128>}, {transform_indices = @transform_3, window_bounds = array<i64: 1, 4, 1, 128>}]} {
    %c0_i32 = arith.constant 0 : i32
    %0 = arith.cmpi eq, %arg1, %c0_i32 : i32
    %1 = arith.extui %0 : i1 to i32
    %c0_i32_0 = arith.constant 0 : i32
    %2 = arith.cmpi ne, %1, %c0_i32_0 : i32
    scf.if %2 {
      %cst_27 = arith.constant 0.000000e+00 : f32
      %28 = vector.broadcast %cst_27 : f32 to vector<1x4x1x128xf32>
      %c0_28 = arith.constant 0 : index
      %c0_29 = arith.constant 0 : index
      %c0_30 = arith.constant 0 : index
      %c0_31 = arith.constant 0 : index
      %29 = vector.load %arg4[%c0_28, %c0_29, %c0_30, %c0_31] : memref<1x4x1x128xf32, #tpu.memory_space<vmem>>, vector<1x4x1x128xf32>
      tpu.vector_store %arg4[%c0_28, %c0_29, %c0_30, %c0_31], %28 {strides = array<i32>} : memref<1x4x1x128xf32, #tpu.memory_space<vmem>>, vector<1x4x1x128xf32>,
      %cst_32 = arith.constant 0.000000e+00 : f32
      %30 = vector.broadcast %cst_32 : f32 to vector<1x4x1x128xf32>
      %c0_33 = arith.constant 0 : index
      %c0_34 = arith.constant 0 : index
      %c0_35 = arith.constant 0 : index
      %c0_36 = arith.constant 0 : index
      %31 = vector.load %arg5[%c0_33, %c0_34, %c0_35, %c0_36] : memref<1x4x1x128xf32, #tpu.memory_space<vmem>>, vector<1x4x1x128xf32>
      tpu.vector_store %arg5[%c0_33, %c0_34, %c0_35, %c0_36], %30 {strides = array<i32>} : memref<1x4x1x128xf32, #tpu.memory_space<vmem>>, vector<1x4x1x128xf32>,
    } else {
    }
    %c0 = arith.constant 0 : index
    %c0_1 = arith.constant 0 : index
    %c0_2 = arith.constant 0 : index
    %c0_3 = arith.constant 0 : index
    %3 = vector.load %arg2[%c0, %c0_1, %c0_2, %c0_3] : memref<1x4x2x128xf32, #tpu.memory_space<vmem>>, vector<1x4x2x128xf32>
    %c0_4 = arith.constant 0 : index
    %c0_5 = arith.constant 0 : index
    %c0_6 = arith.constant 0 : index
    %c0_7 = arith.constant 0 : index
    %4 = vector.load %arg3[%c0_4, %c0_5, %c0_6, %c0_7] : memref<1x4x2x128xf32, #tpu.memory_space<vmem>>, vector<1x4x2x128xf32>
    %cst = arith.constant dense<0xFF800000> : vector<1x2x128xf32>
    %5 = vector.multi_reduction <maximumf>, %3, %cst [1] : vector<1x4x2x128xf32> to vector<1x2x128xf32>
    %6 = vector.shape_cast %5 : vector<1x2x128xf32> to vector<1x1x2x128xf32>
    %7 = vector.broadcast %6 : vector<1x1x2x128xf32> to vector<1x4x2x128xf32>
    %8 = arith.subf %3, %7 : vector<1x4x2x128xf32>
    %9 = math.exp %8 : vector<1x4x2x128xf32>
    %cst_8 = arith.constant dense<0.000000e+00> : vector<1x2x128xf32>
    %10 = vector.multi_reduction <add>, %9, %cst_8 [1] : vector<1x4x2x128xf32> to vector<1x2x128xf32>
    %11 = vector.shape_cast %10 : vector<1x2x128xf32> to vector<1x1x2x128xf32>
    %12 = tpu.reciprocal %11 {approx = true} : vector<1x1x2x128xf32> -> vector<1x1x2x128xf32>
    %13 = vector.broadcast %12 : vector<1x1x2x128xf32> to vector<1x4x2x128xf32>
    %14 = arith.mulf %9, %13 : vector<1x4x2x128xf32>
    %15 = arith.addf %14, %4 : vector<1x4x2x128xf32>
    %c0_9 = arith.constant 0 : index
    %c0_10 = arith.constant 0 : index
    %c0_11 = arith.constant 0 : index
    %c0_12 = arith.constant 0 : index
    %16 = vector.load %arg4[%c0_9, %c0_10, %c0_11, %c0_12] : memref<1x4x1x128xf32, #tpu.memory_space<vmem>>, vector<1x4x1x128xf32>
    %17 = arith.mulf %14, %4 : vector<1x4x2x128xf32>
    %cst_13 = arith.constant dense<0.000000e+00> : vector<1x4x128xf32>
    %18 = vector.multi_reduction <add>, %17, %cst_13 [2] : vector<1x4x2x128xf32> to vector<1x4x128xf32>
    %19 = vector.shape_cast %18 : vector<1x4x128xf32> to vector<1x4x1x128xf32>
    %20 = arith.addf %16, %19 : vector<1x4x1x128xf32>
    %c0_14 = arith.constant 0 : index
    %c0_15 = arith.constant 0 : index
    %c0_16 = arith.constant 0 : index
    %c0_17 = arith.constant 0 : index
    %21 = vector.load %arg4[%c0_14, %c0_15, %c0_16, %c0_17] : memref<1x4x1x128xf32, #tpu.memory_space<vmem>>, vector<1x4x1x128xf32>
    tpu.vector_store %arg4[%c0_14, %c0_15, %c0_16, %c0_17], %20 {strides = array<i32>} : memref<1x4x1x128xf32, #tpu.memory_space<vmem>>, vector<1x4x1x128xf32>,
    %c0_18 = arith.constant 0 : index
    %c0_19 = arith.constant 0 : index
    %c0_20 = arith.constant 0 : index
    %c0_21 = arith.constant 0 : index
    %22 = vector.load %arg5[%c0_18, %c0_19, %c0_20, %c0_21] : memref<1x4x1x128xf32, #tpu.memory_space<vmem>>, vector<1x4x1x128xf32>
    %23 = arith.mulf %15, %15 : vector<1x4x2x128xf32>
    %cst_22 = arith.constant dense<0.000000e+00> : vector<1x4x128xf32>
    %24 = vector.multi_reduction <add>, %23, %cst_22 [2] : vector<1x4x2x128xf32> to vector<1x4x128xf32>
    %25 = vector.shape_cast %24 : vector<1x4x128xf32> to vector<1x4x1x128xf32>
    %26 = arith.addf %22, %25 : vector<1x4x1x128xf32>
    %c0_23 = arith.constant 0 : index
    %c0_24 = arith.constant 0 : index
    %c0_25 = arith.constant 0 : index
    %c0_26 = arith.constant 0 : index
    %27 = vector.load %arg5[%c0_23, %c0_24, %c0_25, %c0_26] : memref<1x4x1x128xf32, #tpu.memory_space<vmem>>, vector<1x4x1x128xf32>
    tpu.vector_store %arg5[%c0_23, %c0_24, %c0_25, %c0_26], %26 {strides = array<i32>} : memref<1x4x1x128xf32, #tpu.memory_space<vmem>>, vector<1x4x1x128xf32>,
    return
  }
  func.func @transform_0(%arg0: i32, %arg1: i32) -> (i32, i32, i32, i32) {
    %c0_i32 = arith.constant 0 : i32
    %c0_i32_0 = arith.constant 0 : i32
    %c0_i32_1 = arith.constant 0 : i32
    return %arg0, %c0_i32, %arg1, %c0_i32_0 : i32, i32, i32, i32
  }
  func.func @transform_1(%arg0: i32, %arg1: i32) -> (i32, i32, i32, i32) {
    %c0_i32 = arith.constant 0 : i32
    %c0_i32_0 = arith.constant 0 : i32
    %c0_i32_1 = arith.constant 0 : i32
    return %arg0, %c0_i32, %arg1, %c0_i32_0 : i32, i32, i32, i32
  }
  func.func @transform_2(%arg0: i32, %arg1: i32) -> (i32, i32, i32, i32) {
    %c0_i32 = arith.constant 0 : i32
    %c0_i32_0 = arith.constant 0 : i32
    %c0_i32_1 = arith.constant 0 : i32
    %c0_i32_2 = arith.constant 0 : i32
    return %arg0, %c0_i32, %c0_i32_0, %c0_i32_1 : i32, i32, i32, i32
  }
  func.func @transform_3(%arg0: i32, %arg1: i32) -> (i32, i32, i32, i32) {
    %c0_i32 = arith.constant 0 : i32
    %c0_i32_0 = arith.constant 0 : i32
    %c0_i32_1 = arith.constant 0 : i32
    %c0_i32_2 = arith.constant 0 : i32
    return %arg0, %c0_i32, %c0_i32_0, %c0_i32_1 : i32, i32, i32, i32
  }
}

</mosaic_0001>

<bundles_post_ra>
// kernel: tpu_custom_call.1
= control target key start
LH: loop header
LB: loop body
LE: loop exit
PB: predicated region body
PF: predicated region fallthrough
CT: control target
= control target key end

     0   :  { %s1119_s0 = inlined_call_operand.hbm [shape: f32[2,4,2,128], index: 0, kind: input, shape index: {}]   ;;  %s1120_s1 = inlined_call_operand.hbm [shape: f32[2,4,2,128], index: 1, kind: input, shape index: {}]   ;;  %s1121_s2 = inlined_call_operand.hbm [shape: f32[2,4,1,128], index: 2, kind: output, shape index: {0}]   ;;  %s1122_s3 = inlined_call_operand.hbm [shape: f32[2,4,1,128], index: 3, kind: output, shape index: {1}]  }
   0x1   :  { %1123 = sst [smem:[#allocation14_spill]] %s1119_s0 }
   0x2   :  { %9 = vsyncpa [#allocation3], 0 }
   0x3   :  { %11 = vsyncpa [#allocation3 + $0x1], 0 }
   0x4   :  { %12 = vsyncpa [#allocation6], 0 }
   0x5   :  { %14 = vsyncpa [#allocation6 + $0x1], 0 }
   0x6   :  { %15 = vsyncpa [#allocation4], 0 }
   0x7   :  { %17 = vsyncpa [#allocation4 + $0x1], 0 }
   0x8   :  { %18 = vsyncpa [#allocation9], 0 }
   0x9   :  { %20 = vsyncpa [#allocation9 + $0x1], 0  ;;  %s898_s12 = smov 0   ;;  %s900_s13 = smov 0  }
   0xa   :  { %s902_s14 = smov 0   ;;  %s904_s15 = smov 0  }
   0xb   :  { %s906_s16 = smov 0   ;;  %s908_s17 = smov 0  }
   0xc LB: > { %s583_s18 = sadd.s32 4294967295, %s871_s17   ;;  %s584_s19 = sadd.s32 4294967294, %s871_s17   ;;  %s871_s17 = sphi %s908_s17, %s26_s17   ;;  %s867_s16 = sphi %s906_s16, %s1134_s16   ;;  %s863_s15 = sphi %s904_s15, %s1133_s15   ;;  %s859_s14 = sphi %s902_s14, %s1132_s14   ;;  %s855_s13 = sphi %s900_s13, %s1131_s13   ;;  %s851_s12 = sphi %s898_s12, %s1130_s12  }
   0xd   : > { %s38_s20 = sadd.s32 1, %s867_s16  ;;  %s47_s21 = sadd.s32 1, %s859_s14 }
   0xe   : > { %p40_p0 = scmp.ge.s32.totalorder %s38_s20, 2  ;;  %p54_p1 = scmp.ne.s32.totalorder %s859_s14, %s855_s13 }
   0xf   : > { %p55_p2 = scmp.eq.s32.totalorder %s871_s17, 0  ;;  %p60_p3 = scmp.ne.s32.totalorder %s855_s13, %s851_s12 }
  0x10   : > { %s1136_s20 = smov (%p40_p0, %s38_s20), 0  ;;  %p61_p5 = scmp.eq.s32.totalorder %s583_s18, 0 }
  0x11   : > { %p939_p4 = por %p55_p2, %p54_p1  ;;  %s42_s23 = ssub.s32 %s867_s16, %s1136_s20 }
  0x12   : > { %p112_p6 = scmp.eq.s32.totalorder %s583_s18, 1  ;;  %p45_p7 = scmp.eq.s32.totalorder %s42_s23, 0 }
  0x13   : > { %p945_p8 = por %p61_p5, %p60_p3  ;;  %p118_p10 = scmp.eq.s32.totalorder %s584_s19, 1 }
  0x14   : > { %p949_p9 = por %p112_p6, %p54_p1  ;;  %p586_p12 = scmp.ge.s32.totalorder %s871_s17, 2 }
  0x15   : > { %s954_s26 = scalar_select %p45_p7, %s859_s14, %s47_s21  }
  0x16   : > { %p956_p11 = por %p118_p10, %p60_p3  ;;  %p628_p13 = scmp.lt.s32.totalorder %s871_s17, 2 }
  0x17   : > { %s963_s28 = sand.u32 1, %s859_s14   ;;  %s604_s30 = sshll.u32 %s867_s16, 3 }
  0x18   : > { %s587_s29 = sshll.u32 %s963_s28, 3  ;;  %s1128_s0 = sld [smem:[#allocation14_spill]] }
  0x19   : > { %s168_s7 = scalar_lea.vmem [#allocation2], %s587_s29  ;;  %p972_p0 = pnand %p628_p13, %p939_p4 }
  0x1a   : > { %s177_s8 = sshll.u32 %s168_s7, 4  ;;  %p593_p1 = scmp.ge.s32.totalorder %s871_s17, 1  ;;  %s178_s8 = int_to_ptr.vmem [resolvable:$true] %s177_s8 }
  0x1b   : > { %s165_s11 = scalar_lea.sflag [#allocation3], %s963_s28  ;;  %s873_s18 = smov 32  }
  0x1c   : > { %s874_s19 = smov 2   ;;  %p208_p2 = scmp.lt.s32.totalorder %s871_s17, 3 }
  0x1d   : > { %s197_s4 = scalar_lea.hbm %s1120_s1, %s604_s30  ;;  %s191_s22 = scalar_lea.vmem [#allocation5], %s587_s29 }
  0x1e   : > { %s174_s6 = scalar_lea.hbm %s1128_s0, %s604_s30  ;;  %p209_p3 = pnand %p593_p1, %p208_p2 }
  0x1f   : > { %s175_s9 = sshll.u32 %s174_s6, 4  ;;  %s198_s5 = sshll.u32 %s197_s4, 4  ;;  %s176_s9 = int_to_ptr.hbm [resolvable:$true] %s175_s9  ;;  %s199_s5 = int_to_ptr.hbm [resolvable:$true] %s198_s5 }
  0x20   : > { %617 = dma.hbm_to_vmem [thread:$0]  (!%p972_p0), %s176_s9, 128, %s178_s8, %s165_s11, %s873_s18, %s873_s18, %s874_s19  }
  0x21   : > { %s200_s6 = sshll.u32 %s191_s22, 4  ;;  %s188_s7 = scalar_lea.sflag [#allocation6], %s963_s28  ;;  %s201_s6 = int_to_ptr.vmem [resolvable:$true] %s200_s6 }
  0x22   : > { %620 = dma.hbm_to_vmem [thread:$0]  (!%p972_p0), %s199_s5, 128, %s201_s6, %s188_s7, %s873_s18, %s873_s18, %s874_s19  }
  0x23   : > { %212 = sbr.rel (%p209_p3) target bundleno = 115 (0x73), region = 28  ;;  %s988_s0 = sand.u32 (!%p209_p3), 1, %s855_s13  }
  0x24   : > { %s594_s8 = sshll.u32 (!%p209_p3), %s988_s0, 3  ;;  %s215_s9 = scalar_lea.sflag (!%p209_p3), [#allocation3], %s988_s0 }
  0x25   : > { %s218_s11 = scalar_lea.vmem (!%p209_p3), [#allocation2], %s594_s8 }
  0x28   : > { %834 = dma.done.wait (%p945_p8), %s215_s9, 128  }
  0x29   : > { %836 = vsyncadd (%p945_p8), %s215_s9, 4294967168  ;;  %s225_s28 = scalar_lea.sflag [#allocation6], %s988_s0  ;;  %s997_s29 = scalar_lea.vmem [#allocation5], %s594_s8 }
  0x2a   : > { %838 = dma.done.wait (%p945_p8), %s225_s28, 128  }
  0x2b   : > { %840 = vsyncadd (%p945_p8), %s225_s28, 4294967168  ;;  %s596_s30 = sshll.u32 %s988_s0, 2  ;;  %v875_v0 = vmov 0.0   ;;  %vm282_vm0 = vcmask 1041408   ;;  %v274_v1 = vld [vmem:[%s218_s11] sm:$0x3] }
  0x2c   : > { %s1004_s10 = scalar_lea.vmem [#allocation7], %s596_s30  ;;  %s1010_s18 = scalar_lea.vmem [#allocation8], %s596_s30  ;;  %v275_v2 = vld [vmem:[%s218_s11 + $0x2] sm:$0x3]  ;;  %v276_v3 = vld [vmem:[%s218_s11 + $0x4] sm:$0x3] }
  0x2d   : > { %266 = vst [vmem:[%s1004_s10] sm:$0x1] %v875_v0  ;;  %v277_v4 = vld [vmem:[%s218_s11 + $0x6] sm:$0x3]  ;;  %v283_v5 = vsel %vm282_vm0, %v274_v1, -inf  ;;  %v284_v6 = vsel %vm282_vm0, %v275_v2, -inf  ;;  %v285_v7 = vsel %vm282_vm0, %v276_v3, -inf }
  0x2e   : > { %267 = vst [vmem:[%s1004_s10 + $0x1] sm:$0x1] %v875_v0  ;;  %v286_v8 = vsel %vm282_vm0, %v277_v4, -inf  ;;  %v287_v9 = vmax.f32 %v283_v5, %v284_v6  ;;  %v278_v32 = vld [vmem:[%s997_s29] sm:$0x3]  ;;  %s600_s24 = sshll.u32 %s863_s15, 2 }
  0x2f   : > { %268 = vst [vmem:[%s1004_s10 + $0x2] sm:$0x1] %v875_v0  ;;  %v288_v10 = vmax.f32 %v285_v7, %v286_v8  ;;  %v279_v34 = vld [vmem:[%s997_s29 + $0x2] sm:$0x3]  ;;  %v280_v36 = vld [vmem:[%s997_s29 + $0x4] sm:$0x3]  ;;  %s1046_s23 = scalar_lea.hbm %s1121_s2, %s600_s24  ;;  %s1061_s7 = scalar_lea.hbm %s1122_s3, %s600_s24 }
  0x30   : > { %269 = vst [vmem:[%s1004_s10 + $0x3] sm:$0x1] %v875_v0  ;;  %v281_v38 = vld [vmem:[%s997_s29 + $0x6] sm:$0x3]  ;;  %s423_s4 = sshll.u32 %s1004_s10, 4  ;;  %s425_s5 = sshll.u32 %s1046_s23, 4  ;;  %s1051_s4 = int_to_ptr.vmem [resolvable:$true] %s423_s4  ;;  %s426_s5 = int_to_ptr.hbm [resolvable:$true] %s425_s5 }
  0x31   : > { %270 = vst [vmem:[%s1010_s18] sm:$0x1] %v875_v0  ;;  %v289_v11 = vmax.f32 %v287_v9, %v288_v10  ;;  %s439_s15 = sshll.u32 %s1010_s18, 4  ;;  %s441_s8 = sshll.u32 %s1061_s7, 4  ;;  %s440_s15 = int_to_ptr.vmem [resolvable:$true] %s439_s15  ;;  %s442_s8 = int_to_ptr.hbm [resolvable:$true] %s441_s8 }
  0x32   : > { %271 = vst [vmem:[%s1010_s18 + $0x1] sm:$0x1] %v875_v0  ;;  %s407_s9 = scalar_lea.sflag [#allocation4], %s988_s0  ;;  %s767_s11 = sshra.s32 %s426_s5, 4  ;;  %s768_s11 = int_to_ptr.hbm [resolvable:$true] %s767_s11 }
  0x33   : > { %272 = vst [vmem:[%s1010_s18 + $0x2] sm:$0x1] %v875_v0  ;;  %v290_v12 = vsub.f32 %v274_v1, %v289_v11  ;;  %v291_v13 = vsub.f32 %v275_v2, %v289_v11  ;;  %v292_v14 = vsub.f32 %v276_v3, %v289_v11  ;;  %v293_v15 = vsub.f32 %v277_v4, %v289_v11  ;;  %s769_s28 = scalar_lea.hbm %s768_s11, 4  ;;  %s773_s24 = scalar_lea.hbm %s1121_s2, 8 }
  0x34   : > { %273 = vst [vmem:[%s1010_s18 + $0x3] sm:$0x1] %v875_v0  ;;  %p770_p4 = scmp.ne.s32.totalorder %s768_s11, %s769_s28  ;;  %p774_p7 = scmp.lt.s32.totalorder %s768_s11, %s1121_s2 }
  0x35   : > { %v294_v16 = vmul.f32 1.442695, %v290_v12  ;;  %v296_v17 = vmul.f32 1.442695, %v291_v13  ;;  %v298_v18 = vmul.f32 1.442695, %v292_v14  ;;  %p775_p8 = scmp.lt.s32.totalorder %s773_s24, %s769_s28 }
  0x36   : > { %v300_v19 = vmul.f32 1.442695, %v293_v15  ;;  %p771_p5 = pnand %p770_p4, %p949_p9 }
  0x37   : > { %683 = vpow2.f32 %v294_v16  ;;  %v318_v16 = vld [vmem:[%s1004_s10] sm:$0x1]  ;;  %p776_p10 = por %p775_p8, %p774_p7 }
  0x38   : > { %685 = vpow2.f32 %v296_v17  ;;  %v319_v17 = vld [vmem:[%s1004_s10 + $0x1] sm:$0x1]  ;;  %p772_p6 = pneg %p771_p5 }
  0x39   : > { %687 = vpow2.f32 %v298_v18 }
  0x3a   : > { %689 = vpow2.f32 %v300_v19  ;;  %p777_p13 = pnand %p776_p10, %p772_p6 }
  0x3d   : > { %v684_v20 = vpop.eup %683 }
  0x3e   : > { %v686_v21 = vpop.eup %685  ;;  %v302_v22 = vsel %vm282_vm0, %v684_v20, 0.0 }
  0x3f   : > { %v688_v23 = vpop.eup %687  ;;  %v303_v24 = vsel %vm282_vm0, %v686_v21, 0.0 }
  0x40   : > { %v690_v25 = vpop.eup %689  ;;  %v304_v26 = vadd.f32 %v303_v24, %v302_v22  ;;  %v305_v27 = vsel %vm282_vm0, %v688_v23, 0.0  ;;  %v320_v24 = vld [vmem:[%s1004_s10 + $0x2] sm:$0x1] }
  0x41   : > { %v307_v28 = vsel %vm282_vm0, %v690_v25, 0.0 }
  0x42   : > { %v306_v29 = vadd.f32 %v305_v27, %v304_v26  ;;  %v321_v27 = vld [vmem:[%s1004_s10 + $0x3] sm:$0x1] }
  0x44   : > { %v308_v30 = vadd.f32 %v307_v28, %v306_v29 }
  0x46   : > { %691 = vrcp.f32 %v308_v30 }
  0x4c   : > { %v692_v31 = vpop.eup %691 }
  0x4d   : > { %v310_v33 = vmul.f32 %v692_v31, %v684_v20  ;;  %v311_v35 = vmul.f32 %v692_v31, %v686_v21  ;;  %v312_v37 = vmul.f32 %v692_v31, %v688_v23  ;;  %v313_v39 = vmul.f32 %v692_v31, %v690_v25 }
  0x4f   : > { %v322_v40 = vmul.f32 %v310_v33, %v278_v32  ;;  %v323_v41 = vmul.f32 %v311_v35, %v279_v34  ;;  %v324_v42 = vmul.f32 %v312_v37, %v280_v36  ;;  %v325_v43 = vmul.f32 %v313_v39, %v281_v38 }
  0x50   : > { %v314_v44 = vadd.f32 %v310_v33, %v278_v32  ;;  %v315_v45 = vadd.f32 %v311_v35, %v279_v34  ;;  %v316_v46 = vadd.f32 %v312_v37, %v280_v36  ;;  %v317_v47 = vadd.f32 %v313_v39, %v281_v38 }
  0x51   : > { %v326_v48 = vsel %vm282_vm0, %v322_v40, 0.0  ;;  %v333_v49 = vsel %vm282_vm0, %v323_v41, 0.0  ;;  %v340_v50 = vsel %vm282_vm0, %v324_v42, 0.0  ;;  %v347_v51 = vsel %vm282_vm0, %v325_v43, 0.0 }
  0x52   : > { %v327_v52 = vrot.slane %v326_v48, 4  ;;  %v334_v53 = vrot.slane %v333_v49, 4  ;;  %v341_v54 = vrot.slane %v340_v50, 4  ;;  %v348_v55 = vrot.slane %v347_v51, 4 }
  0x53   : > { %v366_v56 = vmul.f32 %v314_v44, %v314_v44  ;;  %v367_v57 = vmul.f32 %v315_v45, %v315_v45  ;;  %v368_v58 = vmul.f32 %v316_v46, %v316_v46  ;;  %v369_v59 = vmul.f32 %v317_v47, %v317_v47  ;;  %v362_v44 = vld [vmem:[%s1010_s18] sm:$0x1] }
  0x54   : > { %v328_v60 = vadd.f32 %v327_v52, %v326_v48  ;;  %v335_v61 = vadd.f32 %v334_v53, %v333_v49  ;;  %v342_v62 = vadd.f32 %v341_v54, %v340_v50  ;;  %v349_v63 = vadd.f32 %v348_v55, %v347_v51  ;;  %v363_v49 = vld [vmem:[%s1010_s18 + $0x1] sm:$0x1]  ;;  %v364_v50 = vld [vmem:[%s1010_s18 + $0x2] sm:$0x1]  ;;  %v365_v54 = vld [vmem:[%s1010_s18 + $0x3] sm:$0x1] }
  0x55   : > { %v370_v0 = vsel %vm282_vm0, %v366_v56, 0.0  ;;  %v377_v1 = vsel %vm282_vm0, %v367_v57, 0.0  ;;  %v384_v2 = vsel %vm282_vm0, %v368_v58, 0.0  ;;  %v391_v3 = vsel %vm282_vm0, %v369_v59, 0.0 }
  0x56   : > { %v329_v4 = vrot.slane %v328_v60, 2  ;;  %v336_v5 = vrot.slane %v335_v61, 2  ;;  %v343_v6 = vrot.slane %v342_v62, 2  ;;  %v350_v7 = vrot.slane %v349_v63, 2 }
  0x57   : > { %v371_v8 = vrot.slane %v370_v0, 4  ;;  %v378_v9 = vrot.slane %v377_v1, 4  ;;  %v385_v10 = vrot.slane %v384_v2, 4  ;;  %v392_v11 = vrot.slane %v391_v3, 4 }
  0x58   : > { %v330_v12 = vadd.f32 %v329_v4, %v328_v60  ;;  %v337_v13 = vadd.f32 %v336_v5, %v335_v61  ;;  %v344_v14 = vadd.f32 %v343_v6, %v342_v62  ;;  %v351_v15 = vadd.f32 %v350_v7, %v349_v63 }
  0x59   : > { %v372_v18 = vadd.f32 %v371_v8, %v370_v0  ;;  %v379_v19 = vadd.f32 %v378_v9, %v377_v1  ;;  %v386_v20 = vadd.f32 %v385_v10, %v384_v2  ;;  %v393_v21 = vadd.f32 %v392_v11, %v391_v3 }
  0x5a   : > { %v331_v22 = vrot.slane %v330_v12, 1  ;;  %v338_v23 = vrot.slane %v337_v13, 1  ;;  %v345_v25 = vrot.slane %v344_v14, 1  ;;  %v352_v26 = vrot.slane %v351_v15, 1 }
  0x5b   : > { %v373_v28 = vrot.slane %v372_v18, 2  ;;  %v380_v29 = vrot.slane %v379_v19, 2  ;;  %v387_v30 = vrot.slane %v386_v20, 2  ;;  %v394_v31 = vrot.slane %v393_v21, 2 }
  0x5c   : > { %v332_v32 = vadd.f32 %v331_v22, %v330_v12  ;;  %v339_v33 = vadd.f32 %v338_v23, %v337_v13  ;;  %v346_v34 = vadd.f32 %v345_v25, %v344_v14  ;;  %v353_v35 = vadd.f32 %v352_v26, %v351_v15 }
  0x5d   : > { %v374_v36 = vadd.f32 %v373_v28, %v372_v18  ;;  %v381_v37 = vadd.f32 %v380_v29, %v379_v19  ;;  %v388_v38 = vadd.f32 %v387_v30, %v386_v20  ;;  %v395_v39 = vadd.f32 %v394_v31, %v393_v21 }
  0x5e   : > { %v354_v40 = vadd.f32 %v332_v32, %v318_v16  ;;  %v355_v41 = vadd.f32 %v339_v33, %v319_v17  ;;  %v356_v42 = vadd.f32 %v346_v34, %v320_v24  ;;  %v357_v43 = vadd.f32 %v353_v35, %v321_v27 }
  0x5f   : > { %v375_v45 = vrot.slane %v374_v36, 1  ;;  %v382_v46 = vrot.slane %v381_v37, 1  ;;  %v389_v47 = vrot.slane %v388_v38, 1  ;;  %v396_v48 = vrot.slane %v395_v39, 1 }
  0x60   : > { %358 = vst [vmem:[%s1004_s10] sm:$0x1] %v354_v40 }
  0x61   : > { %359 = vst [vmem:[%s1004_s10 + $0x1] sm:$0x1] %v355_v41  ;;  %v376_v51 = vadd.f32 %v375_v45, %v374_v36  ;;  %v383_v52 = vadd.f32 %v382_v46, %v381_v37  ;;  %v390_v53 = vadd.f32 %v389_v47, %v388_v38  ;;  %v397_v55 = vadd.f32 %v396_v48, %v395_v39 }
  0x62   : > { %360 = vst [vmem:[%s1004_s10 + $0x2] sm:$0x1] %v356_v42 }
  0x63   : > { %361 = vst [vmem:[%s1004_s10 + $0x3] sm:$0x1] %v357_v43  ;;  %v398_v56 = vadd.f32 %v376_v51, %v362_v44  ;;  %v399_v57 = vadd.f32 %v383_v52, %v363_v49  ;;  %v400_v58 = vadd.f32 %v390_v53, %v364_v50  ;;  %v401_v59 = vadd.f32 %v397_v55, %v365_v54 }
  0x64   : > { %780 = shalt.err (!%p777_p13)
}
  0x65   : > { %s876_s21 = smov 16   ;;  %s877_s23 = smov 1   ;;  %402 = vst [vmem:[%s1010_s18] sm:$0x1] %v398_v56 }
  0x66   : > { %610 = dma.vmem_to_hbm [thread:$0]  (%p949_p9), %s1051_s4, 64, %s426_s5, %s407_s9, %s876_s21, %s876_s21, %s877_s23  }
  0x67   : > { %403 = vst [vmem:[%s1010_s18 + $0x1] sm:$0x1] %v399_v57  ;;  %s412_s22 = scalar_lea.sflag [#allocation9], %s988_s0  ;;  %s795_s6 = sshra.s32 %s442_s8, 4  ;;  %s796_s6 = int_to_ptr.hbm [resolvable:$true] %s795_s6 }
  0x68   : > { %404 = vst [vmem:[%s1010_s18 + $0x2] sm:$0x1] %v400_v58  ;;  %s797_s7 = scalar_lea.hbm %s796_s6, 4  ;;  %s801_s29 = scalar_lea.hbm %s1122_s3, 8 }
  0x69   : > { %405 = vst [vmem:[%s1010_s18 + $0x3] sm:$0x1] %v401_v59  ;;  %p798_p0 = scmp.ne.s32.totalorder %s796_s6, %s797_s7  ;;  %p802_p3 = scmp.lt.s32.totalorder %s796_s6, %s1122_s3 }
  0x6a   : > { %p803_p4 = scmp.lt.s32.totalorder %s801_s29, %s797_s7 }
  0x6b   : > { %p799_p1 = pnand %p798_p0, %p949_p9 }
  0x6c   : > { %p804_p5 = por %p803_p4, %p802_p3 }
  0x6d   : > { %p800_p2 = pneg %p799_p1 }
  0x6f   : > { %p805_p6 = pnand %p804_p5, %p800_p2 }
  0x71   : > { %808 = shalt.err (!%p805_p6)
}
  0x72   : > { %611 = dma.vmem_to_hbm [thread:$0]  (%p949_p9), %s440_s15, 64, %s442_s8, %s412_s22, %s876_s21, %s876_s21, %s877_s23  }
  0x73 PF: > { %s456_s0 = sand.u32 1, %s851_s12   ;;  %p622_p7 = pnand %p586_p12, %p956_p11 }
  0x74   : > { %s457_s18 = scalar_lea.sflag [#allocation4], %s456_s0 }
  0x75   : > { %p623_p8 = pneg %p622_p7 }
  0x77   : > { %842 = dma.done.wait (%p623_p8), %s457_s18, 64  }
  0x78   : > { %844 = vsyncadd (%p623_p8), %s457_s18, 4294967232  ;;  %s467_s5 = scalar_lea.sflag [#allocation9], %s456_s0 }
  0x79   : > { %846 = dma.done.wait (%p623_p8), %s467_s5, 64  }
  0x7a   : > { %848 = vsyncadd (%p623_p8), %s467_s5, 4294967232  ;;  %s26_s17 = sadd.s32 1, %s871_s17   ;;  %s1130_s12 = smov %s855_s13 }
  0x7b   : > { %p23_p10 = scmp.ge.s32.totalorder %s26_s17, 4   ;;  %s1131_s13 = smov %s859_s14 }
  0x7c   : > { %s1132_s14 = smov %s954_s26  ;;  %s1133_s15 = smov %s867_s16 }
  0x7d   : > { %s1134_s16 = smov %s1136_s20  ;;  %25 = sbr.rel (!%p23_p10) target bundleno = 12 (0xc), region = 107 }
  0x82   :  { %473 = vsyncpa [#allocation3], 1 }
  0x83   :  { %475 = vsyncpa [#allocation3 + $0x1], 1 }
  0x84   :  { %476 = vsyncpa [#allocation6], 1 }
  0x85   :  { %478 = vsyncpa [#allocation6 + $0x1], 1 }
  0x86   :  { %479 = vsyncpa [#allocation4], 1 }
  0x87   :  { %481 = vsyncpa [#allocation4 + $0x1], 1 }
  0x88   :  { %482 = vsyncpa [#allocation9], 1 }
  0x89   :  { %484 = vsyncpa [#allocation9 + $0x1], 1 }

</bundles_post_ra>
